<compile_context>
chip_gen: v6e
topology: v6e:2x2x1
jax: 0.10.0
libtpu: 0.0.40
codegen_flags: <defaults>
</compile_context>

<pallas_src>
import functools

import jax
import jax.numpy as jnp
from jax import lax
from jax.experimental import pallas as pl
from jax.experimental.pallas import tpu as pltpu


def _round_up(x: int, m: int) -> int:
    return ((x + m - 1) // m) * m


def _ce_loss_kernel(logits_ref, label_ref, out_ref, *, n_rows: int):
    # logits_ref: (TM, C) native dtype (VMEM)
    # label_ref:  (TM, 1) int32        (VMEM)
    # out_ref:    (TM, 1) f32 per-sample loss (padded rows -> 0)
    pid = pl.program_id(0)

    x = logits_ref[...]                                            # (TM, C) native
    tm, c = x.shape
    labels = label_ref[...]                                        # (TM, 1) i32

    # Max on the native dtype (exact for bf16); fuse the f32 cast into the
    # subtraction so no standalone f32 copy of the logits is materialized.
    row_max = jnp.max(x, axis=-1, keepdims=True)                   # (TM, 1) native
    shifted = x.astype(jnp.float32) - row_max.astype(jnp.float32)  # (TM, C) f32
    sum_exp = jnp.sum(jnp.exp(shifted), axis=-1, keepdims=True)    # (TM, 1)

    # Pick the shifted logit at the label index (row_max cancels).
    class_ids = lax.broadcasted_iota(jnp.int32, (tm, c), dimension=1)
    picked_shifted = jnp.sum(
        jnp.where(class_ids == labels, shifted, 0.0),
        axis=-1, keepdims=True)                                    # (TM, 1)

    per_sample = jnp.log(sum_exp) - picked_shifted                 # (TM, 1)

    # Zero out rows that were added as padding on the remainder tile.
    row_ids = pid * tm + lax.broadcasted_iota(jnp.int32, (tm, 1), dimension=0)
    out_ref[...] = jnp.where(row_ids < n_rows, per_sample, 0.0)


def _pick_tile_and_vmem(n: int, c: int, dtype_bytes: int, block_rows):
    """Footprint-aware tile size + generation-aware scoped VMEM limit."""
    # Physical VMEM per core: 128 MiB (v5e/v6e), 64 MiB (v7x).
    try:
        info = pltpu.get_tpu_info()
        vmem_cap = getattr(info, "vmem_capacity_bytes", None) or (64 << 20)
    except Exception:  # not on TPU / query unsupported -> conservative default
        vmem_cap = 64 << 20
    vmem_limit = int(min(64 << 20, vmem_cap // 2))   # 32 MiB on v7x, 64 MiB on v5e/v6e

    if block_rows is None:
        # Per-block footprint ~= TM*C*(2*dtype_bytes [double-buffered input]
        #   + ~16 B [f32 shifted + f32 exp + i32 iota + where temps]).
        # Size TM so this lands at ~2/3 of the scoped VMEM limit.
        per_row_bytes = max(1, c * (2 * dtype_bytes + 16))
        tm = (2 * vmem_limit // 3) // per_row_bytes
    else:
        tm = int(block_rows)

    tm = max(8, (tm // 8) * 8)            # multiple of 8, at least one sublane tile
    tm = min(tm, _round_up(n, 8))         # never bigger than the (padded) batch
    return tm, vmem_limit


def ce_loss(stu_pred: jax.Array, label: jax.Array, *, block_rows=None) -> jax.Array:
    """Cross entropy loss (mean over batch). stu_pred: (N, C) float, label: (N,) int."""
    n, c = stu_pred.shape
    dtype_bytes = jnp.dtype(stu_pred.dtype).itemsize

    tm, vmem_limit = _pick_tile_and_vmem(n, c, dtype_bytes, block_rows)

    n_pad = _round_up(n, tm)
    logits = stu_pred                                 # keep native dtype; cast on-chip
    labels2d = label.astype(jnp.int32).reshape(n, 1)
    if n_pad != n:
        logits = jnp.pad(logits, ((0, n_pad - n), (0, 0)))
        labels2d = jnp.pad(labels2d, ((0, n_pad - n), (0, 0)))

    grid = (pl.cdiv(n_pad, tm),)
    kernel = functools.partial(_ce_loss_kernel, n_rows=n)

    per_sample = pl.pallas_call(
        kernel,
        out_shape=jax.ShapeDtypeStruct((n_pad, 1), jnp.float32),
        grid=grid,
        in_specs=[
            pl.BlockSpec((tm, c), lambda i: (i, 0)),
            pl.BlockSpec((tm, 1), lambda i: (i, 0)),
        ],
        out_specs=pl.BlockSpec((tm, 1), lambda i: (i, 0)),
        compiler_params=pltpu.CompilerParams(
            dimension_semantics=("parallel",),   # no cross-step state -> both TCs on v7x
            vmem_limit_bytes=vmem_limit,
        ),
    )(logits, labels2d)

    # Padded rows were written as 0, so a plain sum over the padded output is exact.
    return jnp.sum(per_sample) / jnp.float32(n)


def ce_loss_reference(stu_pred, label):
    logp = jax.nn.log_softmax(stu_pred.astype(jnp.float32), axis=-1)
    picked = jnp.take_along_axis(logp, label.astype(jnp.int32)[:, None], axis=-1)
    return -jnp.mean(picked)


if __name__ == "__main__":
    key = jax.random.PRNGKey(0)
    k1, k2 = jax.random.split(key)

    N, C = 20, 128  # small batch, lane-aligned class count
    stu_pred = jax.random.normal(k1, (N, C), dtype=jnp.float32)
    label = jax.random.randint(k2, (N,), 0, C, dtype=jnp.int32)

    ref = ce_loss_reference(stu_pred, label)

    # Multi-tile path with a remainder tile (20 rows, TM=8 -> 3 tiles, 4 padded rows).
    loss_tiled = ce_loss(stu_pred, label, block_rows=8)
    jax.block_until_ready(loss_tiled)
    assert jnp.allclose(loss_tiled, ref, rtol=1e-5, atol=1e-5), (loss_tiled, ref)

    # Default (auto, footprint-based) tile size path.
    loss_auto = ce_loss(stu_pred, label)
    jax.block_until_ready(loss_auto)
    assert jnp.allclose(loss_auto, ref, rtol=1e-5, atol=1e-5), (loss_auto, ref)

    # bf16 logits exercise the native-dtype DMA + fused on-chip f32 cast path.
    stu_bf16 = stu_pred.astype(jnp.bfloat16)
    ref_bf16 = ce_loss_reference(stu_bf16, label)
    loss_bf16 = ce_loss(stu_bf16, label)
    jax.block_until_ready(loss_bf16)
    assert jnp.allclose(loss_bf16, ref_bf16, rtol=1e-4, atol=1e-4), (loss_bf16, ref_bf16)

    print("KERNEL_OK")
</pallas_src>

<mosaic_0001>
module attributes {stable_mosaic.version = 11 : i64} {
  func.func @_ce_loss_kernel(%arg0: i32, %arg1: memref<8x128xf32, #tpu.memory_space<vmem>>, %arg2: memref<8x1xi32, #tpu.memory_space<vmem>>, %arg3: memref<8x1xf32, #tpu.memory_space<vmem>>) attributes {dimension_semantics = [#tpu.dimension_semantics<parallel>], iteration_bounds = array<i64: 3>, scalar_prefetch = 0 : i64, scratch_operands = 0 : i64, tpu.core_type = #tpu.core_type<tc>, window_params = [{transform_indices = @transform_0, window_bounds = array<i64: 8, 128>}, {transform_indices = @transform_1, window_bounds = array<i64: 8, 1>}, {transform_indices = @transform_2, window_bounds = array<i64: 8, 1>}]} {
    %c0 = arith.constant 0 : index
    %c0_0 = arith.constant 0 : index
    %0 = vector.load %arg1[%c0, %c0_0] : memref<8x128xf32, #tpu.memory_space<vmem>>, vector<8x128xf32>
    %c0_1 = arith.constant 0 : index
    %c0_2 = arith.constant 0 : index
    %1 = vector.load %arg2[%c0_1, %c0_2] : memref<8x1xi32, #tpu.memory_space<vmem>>, vector<8x1xi32>
    %cst = arith.constant dense<0xFF800000> : vector<8xf32>
    %2 = vector.multi_reduction <maximumf>, %0, %cst [1] : vector<8x128xf32> to vector<8xf32>
    %3 = vector.shape_cast %2 : vector<8xf32> to vector<8x1xf32>
    %4 = vector.broadcast %3 : vector<8x1xf32> to vector<8x128xf32>
    %5 = arith.subf %0, %4 : vector<8x128xf32>
    %6 = math.exp %5 : vector<8x128xf32>
    %cst_3 = arith.constant dense<0.000000e+00> : vector<8xf32>
    %7 = vector.multi_reduction <add>, %6, %cst_3 [1] : vector<8x128xf32> to vector<8xf32>
    %8 = vector.shape_cast %7 : vector<8xf32> to vector<8x1xf32>
    %9 = tpu.iota {dimensions = array<i32: 1>} : vector<8x128xi32>
    %10 = vector.broadcast %1 : vector<8x1xi32> to vector<8x128xi32>
    %11 = arith.cmpi eq, %9, %10 : vector<8x128xi32>
    %cst_4 = arith.constant 0.000000e+00 : f32
    %12 = vector.broadcast %cst_4 : f32 to vector<8x128xf32>
    %13 = arith.select %11, %5, %12 : vector<8x128xi1>, vector<8x128xf32>
    %cst_5 = arith.constant dense<0.000000e+00> : vector<8xf32>
    %14 = vector.multi_reduction <add>, %13, %cst_5 [1] : vector<8x128xf32> to vector<8xf32>
    %15 = vector.shape_cast %14 : vector<8xf32> to vector<8x1xf32>
    %16 = math.log %8 : vector<8x1xf32>
    %17 = arith.subf %16, %15 : vector<8x1xf32>
    %c8_i32 = arith.constant 8 : i32
    %18 = arith.muli %arg0, %c8_i32 : i32
    %19 = tpu.iota {dimensions = array<i32: 0>} : vector<8x1xi32>
    %20 = vector.broadcast %18 : i32 to vector<8x1xi32>
    %21 = arith.addi %20, %19 : vector<8x1xi32>
    %c20_i32 = arith.constant 20 : i32
    %22 = vector.broadcast %c20_i32 : i32 to vector<8x1xi32>
    %23 = arith.cmpi slt, %21, %22 : vector<8x1xi32>
    %cst_6 = arith.constant 0.000000e+00 : f32
    %24 = vector.broadcast %cst_6 : f32 to vector<8x1xf32>
    %25 = arith.select %23, %17, %24 : vector<8x1xi1>, vector<8x1xf32>
    %c0_7 = arith.constant 0 : index
    %c0_8 = arith.constant 0 : index
    %26 = vector.load %arg3[%c0_7, %c0_8] : memref<8x1xf32, #tpu.memory_space<vmem>>, vector<8x1xf32>
    tpu.vector_store %arg3[%c0_7, %c0_8], %25 {strides = array<i32>} : memref<8x1xf32, #tpu.memory_space<vmem>>, vector<8x1xf32>,
    return
  }
  func.func @transform_0(%arg0: i32) -> (i32, i32) {
    %c0_i32 = arith.constant 0 : i32
    %c0_i32_0 = arith.constant 0 : i32
    return %arg0, %c0_i32 : i32, i32
  }
  func.func @transform_1(%arg0: i32) -> (i32, i32) {
    %c0_i32 = arith.constant 0 : i32
    %c0_i32_0 = arith.constant 0 : i32
    return %arg0, %c0_i32 : i32, i32
  }
  func.func @transform_2(%arg0: i32) -> (i32, i32) {
    %c0_i32 = arith.constant 0 : i32
    %c0_i32_0 = arith.constant 0 : i32
    return %arg0, %c0_i32 : i32, i32
  }
}

</mosaic_0001>

<bundles_post_ra>
// kernel: tpu_custom_call.1
= control target key start
LH: loop header
LB: loop body
LE: loop exit
PB: predicated region body
PF: predicated region fallthrough
CT: control target
= control target key end

     0   :  { %s300_s9 = smov 0   ;;  %s330_s0 = inlined_call_operand.vmem [shape: f32[24,128], index: 0, kind: input, shape index: {}]   ;;  %s331_s1 = inlined_call_operand.vmem [shape: s32[24,1], index: 1, kind: input, shape index: {}]   ;;  %s332_s2 = inlined_call_operand.vmem [shape: f32[24,1], index: 2, kind: output, shape index: {}]  }
   0x1 LB: > { %s306_s10 = sadd.s32 4294967295, %s282_s9   ;;  %p255_p0 = scmp.ge.s32.totalorder %s282_s9, 1  ;;  %s282_s9 = sphi %s300_s9, %s12_s9  }
   0x2   : > { %p120_p1 = scmp.lt.s32.totalorder %s282_s9, 4 }
   0x4   : > { %p121_p2 = pnand %p255_p0, %p120_p1 }
   0x5   : > { %p144_p3 = scmp.lt.s32.totalorder (!%p121_p2), %s306_s10, 2  ;;  %s259_s19 = sshll.u32 (!%p121_p2), %s306_s10, 3 }
   0x6   : > { %124 = sbr.rel (%p121_p2) target bundleno = 330 (0x14a), region = 28 }
   0xb   : > { %v284_v0 = vmov 0   ;;  %s145_s11 = scalar_select %p144_p3, %s306_s10, 2  ;;  %v165_v6 = vlaneseq  ;;  %v180_v13 = vstv %s259_s19  ;;  %vm184_vm2 = vcmask 7168  }
   0xc   : > { %271 = vset.pattern.permute.xlu0 %v284_v0 }
   0xd   : > { %s312_s12 = sshll.u32 %s145_s11, 3  ;;  %v166_v7 = vand.u32 127, %v165_v6  ;;  %v179_v12 = vshrl.u32 %v165_v6, 7 }
   0xe   : > { %s147_s15 = scalar_lea.vmem %s330_s0, %s312_s12  ;;  %s151_s18 = scalar_lea.vmem %s331_s1, %s312_s12 }
   0xf   : > { %v156_v1 = vld [vmem:[%s147_s15] sm:$0xff]  ;;  %v181_v14 = vadd.s32 %v180_v13, %v179_v12  ;;  %s155_s22 = scalar_lea.vmem %s332_s2, %s312_s12 }
  0x10   : > { %158 = vmax.xlane.f32.xlu0 %v156_v1  ;;  %v157_v2 = vld [vmem:[%s151_s18] sm:$0xff] }
  0x11   : > { %vm182_vm1 = vcmp.lt.s32.totalorder %v181_v14, 20 }
  0x26   : > { %168 = vperm.xlu0 %271, %v157_v2  }
  0x99   : > { %v159_v3 = vpop.xlane.xlu0 %158 }
  0x9a   : > { %v160_v4 = vsub.f32 %v156_v1, %v159_v3 }
  0x9c   : > { %v161_v5 = vmul.f32 1.442695, %v160_v4 }
  0x9e   : > { %272 = vpow2.f32 %v161_v5 }
  0xa1   : > { %v169_v8 = vpop.permute.xlu0 %168 }
  0xa2   : > { %vm170_vm0 = vcmp.eq.s32.totalorder %v166_v7, %v169_v8 }
  0xa3   : > { %v171_v10 = vsel %vm170_vm0, %v160_v4, 0.0 }
  0xab   : > { %v273_v9 = vpop.eup %272 }
  0xac   : > { %163 = vadd.xlane.f32.xlu1 %v273_v9 }
  0xb0   : > { %172 = vadd.xlane.f32.xlu1 %v171_v10 }
 0x135   : > { %v164_v11 = vpop.xlane.xlu1 %163 }
 0x136   : > { %274 = vlog2.f32 %v164_v11 }
 0x139   : > { %v173_v17 = vpop.xlane.xlu1 %172 }
 0x143   : > { %v275_v15 = vpop.eup %274 }
 0x144   : > { %v175_v16 = vmul.f32 0.6931472, %v275_v15 }
 0x146   : > { %v176_v18 = vsub.f32 %v175_v16, %v173_v17 }
 0x148   : > { %v183_v19 = vsel %vm182_vm1, %v176_v18, 0.0 }
 0x149   : > { %185 = vst.msk [vmem:[%s155_s22] sm:$0xff] %vm184_vm2, %v183_v19 }
 0x14a PF: > { %s12_s9 = sadd.s32 1, %s282_s9  }
 0x14b   : > { %p9_p4 = scmp.ge.s32.totalorder %s12_s9, 5  }
 0x14d   :  { %11 = sbr.rel (!%p9_p4) target bundleno = 1 (0x1), region = 61 }

</bundles_post_ra>
